<compile_context>
chip_gen: v7x
topology: tpu7x:2x2x1
jax: 0.10.0
libtpu: 0.0.40
codegen_flags: <defaults>
</compile_context>

<pallas_src>
import functools

import jax
import jax.numpy as jnp
from jax.experimental import pallas as pl
from jax.experimental.pallas import tpu as pltpu

BASE_BITS = 8.0
MIN_BITS = 2.0
MAX_BITS = 8.0
_EPS = 1e-5
_LANES = 128
_F32 = jnp.float32


def _cdiv(a, b):
    return -(-a // b)


def _round_up(a, b):
    return _cdiv(a, b) * b


def _tpu_info_attr(names, default):
    """Best-effort query of pltpu.get_tpu_info(); never raises."""
    try:
        info = pltpu.get_tpu_info()
    except Exception:
        return default
    for name in names:
        v = getattr(info, name, None)
        if v is None:
            continue
        try:
            v = int(v)
        except (TypeError, ValueError):
            continue
        if v > 0:
            return v
    return default


def _levels_from_bits(bits):
    """2**bits - 1 for integer-valued bits in [2, 8] without EUP exp/round:
    the f32 with value 2**b has bit pattern (b + 127) << 23."""
    e = (bits.astype(jnp.int32) + 127) << 23
    return pltpu.bitcast(e, jnp.float32) - 1.0


def _taq_rows_kernel(scalar_ref, x_ref, o_ref):
    """Per-row path (the logical last dim D maps directly to lanes).

    Tile: (bm, D).  Divides / sigmoid run on (bm, 1) column stats only; per
    element the remaining work is mul / round / mul.
    """
    x = x_ref[...].astype(_F32)
    absx = jnp.abs(x)

    inv_t = scalar_ref[1]                                     # 1 / threshold
    activity = jnp.mean(absx, axis=-1, keepdims=True)         # (bm, 1)
    bits = jnp.round(jnp.clip(BASE_BITS * jax.nn.sigmoid(activity * inv_t),
                              MIN_BITS, MAX_BITS))
    levels = _levels_from_bits(bits)                          # (bm, 1)
    scale = jnp.max(absx, axis=-1, keepdims=True) + _EPS      # (bm, 1)

    k = levels / scale            # exact divide: sets the rounding boundaries
    inv_k = scale / levels
    o_ref[...] = (jnp.round(x * k) * inv_k).astype(o_ref.dtype)


def _taq_packed_kernel(scalar_ref, x_ref, o_ref, *, d):
    """Lane-packed path for small D (128 % d == 0, rows % (128//d) == 0).

    Tile: (bm, 128); each kernel row packs 128 // d logical rows contiguously,
    so every logical row occupies an aligned group of d lanes.  Per-row stats
    are replicated across each d-lane group, so (unlike the rows path) the
    sigmoid and the two divides here run on full (bm, 128) replicated data.
    """
    x = x_ref[...].astype(_F32)
    absx = jnp.abs(x)
    log2d = d.bit_length() - 1

    # --- segmented SUM on the (otherwise idle) MXU ---------------------------
    # seg[i, j] = 1 where lanes i and j belong to the same aligned d-lane
    # group; absx @ seg replicates each logical row's |x|-sum across its
    # group.  precision=HIGHEST keeps f32 accuracy (bits sits next to a
    # round() boundary, so bf16 truncation of |x| is not acceptable).
    li = jax.lax.broadcasted_iota(jnp.int32, (_LANES, _LANES), 0)
    lj = jax.lax.broadcasted_iota(jnp.int32, (_LANES, _LANES), 1)
    seg = ((li >> log2d) == (lj >> log2d)).astype(_F32)
    ssum = jnp.dot(absx, seg, precision=jax.lax.Precision.HIGHEST,
                   preferred_element_type=_F32)

    # --- segmented MAX via an XOR-butterfly on the XLU ------------------------
    # log2(d) steps; partner lane = lane ^ s.  For aligned power-of-two groups
    # the partner sits at +s where bit s is clear and at -s where it is set,
    # so the direction mask is just (lane & s) == 0 on a tiny (1, 128) iota.
    lane = jax.lax.broadcasted_iota(jnp.int32, (1, _LANES), 1)
    smax = absx
    s = 1
    while s < d:
        take_right = (lane & s) == 0             # partner is at lane + s
        partner = jnp.where(take_right,
                            pltpu.roll(smax, _LANES - s, axis=1),
                            pltpu.roll(smax, s, axis=1))
        smax = jnp.maximum(smax, partner)
        s *= 2

    inv_t_over_d = scalar_ref[1] * jnp.float32(1.0 / d)  # (1/threshold) * (1/D)
    bits = jnp.round(jnp.clip(BASE_BITS * jax.nn.sigmoid(ssum * inv_t_over_d),
                              MIN_BITS, MAX_BITS))
    levels = _levels_from_bits(bits)
    scale = smax + _EPS

    k = levels / scale            # exact divide: sets the rounding boundaries
    inv_k = scale / levels
    o_ref[...] = (jnp.round(x * k) * inv_k).astype(o_ref.dtype)


def temporal_adaptive_quantize(x, activity_threshold, *,
                               rows_tile_budget_bytes=4 << 20,  # rows-path I/O tile
                               packed_block_rows=1024):         # packed-path tile
    """Quantize x (..., D) with per-row adaptive bit width.  Same shape/dtype."""
    orig_shape = x.shape
    d = int(orig_shape[-1])
    m = 1
    for s in orig_shape[:-1]:
        m *= int(s)

    t = jnp.asarray(activity_threshold, dtype=jnp.float32)
    scalars = jnp.stack([t, 1.0 / t])             # [threshold, 1/threshold]

    x2 = x.reshape(m, d)
    g = _LANES // d if (d < _LANES and _LANES % d == 0) else 1
    packed = (g > 1) and (m % g == 0)
    # TODO(synk): D < 128 with 128 % D != 0 (and the rare m % (128/D) != 0
    # tail) use a lane-masked (bm, D) layout; a lane-dense repack with masked
    # stats would avoid the vst.msk partial stores there.

    if packed:
        rows, dk = m // g, _LANES
        kernel = functools.partial(_taq_packed_kernel, d=d)
        xk = x2.reshape(rows, dk)                 # contiguous: metadata-only change
        bm_cap = packed_block_rows
    else:
        rows, dk = m, d
        kernel = _taq_rows_kernel
        xk = x2
        bm_cap = max(16, rows_tile_budget_bytes // (dk * 4))

    # --- generation-aware budgets (v7x-class parts only have 64 MiB VMEM) ----
    vmem_phys = _tpu_info_attr(
        ("vmem_capacity_bytes", "vmem_bytes", "vmem_size_bytes"), 128 << 20)
    if vmem_phys < (96 << 20):                    # v7x-class part
        bm_cap = min(bm_cap, 512 if packed else max(16, (2 << 20) // (dk * 4)))
        vmem_cap_est, vmem_limit = 16 << 20, 32 << 20
    else:
        vmem_cap_est, vmem_limit = 24 << 20, 40 << 20

    # --- block-row selection ---------------------------------------------------
    io_bytes = jnp.dtype(x.dtype).itemsize
    per_row_bytes = dk * (4 * io_bytes + 3 * 4)   # in/out double buffers + f32 temps
    if rows <= 16:
        bm = rows                                 # single full-extent block
    else:
        bm = min(bm_cap, rows)
        bm = max(16, (bm // 16) * 16)             # sublane / bf16 friendly
        if bm * per_row_bytes > vmem_cap_est:     # hard VMEM guard for wide D
            bm = max(16, ((vmem_cap_est // per_row_bytes) // 16) * 16)
            # TODO(synk): if one 16-row block still exceeds the budget (huge D),
            # add a second "arbitrary" grid axis over D with carried sum/max.
        ncores = _tpu_info_attr(
            ("num_tensorcores", "tensorcores_per_chip", "num_cores",
             "cores_per_chip", "core_count"), 1)
        if ncores > 1:                            # keep >= 2 grid steps per core
            target = 2 * ncores
            if rows >= target * 16 and _cdiv(rows, bm) < target:
                bm = max(16, _round_up(_cdiv(rows, target), 16))
        bm = min(bm, rows)

    grid_m = _cdiv(rows, bm)                      # ragged last block: clipped DMA

    out = pl.pallas_call(
        kernel,
        out_shape=jax.ShapeDtypeStruct((rows, dk), x.dtype),
        grid_spec=pltpu.PrefetchScalarGridSpec(
            num_scalar_prefetch=1,
            grid=(grid_m,),
            in_specs=[pl.BlockSpec((bm, dk), lambda i, sc: (i, 0))],
            out_specs=pl.BlockSpec((bm, dk), lambda i, sc: (i, 0)),
        ),
        compiler_params=pltpu.CompilerParams(
            dimension_semantics=("parallel",),
            vmem_limit_bytes=vmem_limit,
        ),
    )(scalars, xk)

    return out.reshape(orig_shape)


# ----------------------------- references / checks -----------------------------

def _reference_kernel_algebra(x, threshold):
    """Pure-JAX reference using the kernel's re-associated algebra."""
    xf = x.astype(jnp.float32)
    absx = jnp.abs(xf)
    activity = jnp.mean(absx, axis=-1, keepdims=True)
    bits = jnp.round(jnp.clip(BASE_BITS * jax.nn.sigmoid(activity / threshold),
                              MIN_BITS, MAX_BITS))
    levels = 2.0 ** bits - 1.0
    scale = jnp.max(absx, axis=-1, keepdims=True) + _EPS
    k = levels / scale
    return (jnp.round(xf * k) * (scale / levels)).astype(x.dtype)


def _reference_pytorch(x, threshold):
    """Literal transcription of the PyTorch forward (no re-association)."""
    xf = x.astype(jnp.float32)
    activity = jnp.mean(jnp.abs(xf), axis=-1, keepdims=True)
    bits = jnp.round(jnp.clip(BASE_BITS * jax.nn.sigmoid(activity / threshold),
                              MIN_BITS, MAX_BITS))
    scale = jnp.max(jnp.abs(xf), axis=-1, keepdims=True) + _EPS
    levels = 2.0 ** bits - 1.0
    x_quant = jnp.round((xf / scale) * levels) / levels
    return (x_quant * scale).astype(x.dtype)


def _check(x, y, threshold, label):
    xf = x.astype(jnp.float32)
    yf = y.astype(jnp.float32)
    tol = 1e-5 if x.dtype == jnp.float32 else 1e-2

    # (1) Tight match against the kernel-algebra reference (validates packing,
    #     reductions, the levels bit-trick and ragged-block handling).
    y_k = _reference_kernel_algebra(x, threshold).astype(jnp.float32)
    assert jnp.allclose(yf, y_k, atol=tol, rtol=tol), f"kernel-algebra mismatch: {label}"

    # (2) Against the literal PyTorch forward.  The kernel's re-association
    #     round(x * (levels/scale)) vs round((x/scale) * levels) may flip values
    #     lying within ~1 ULP of a round() boundary; such flips must be
    #     vanishingly rare and each is bounded by one quantization step
    #     (scale / levels, worst case scale / 3 at 2 bits).
    y_pt = _reference_pytorch(x, threshold).astype(jnp.float32)
    err = jnp.abs(yf - y_pt)
    scale = jnp.max(jnp.abs(xf), axis=-1, keepdims=True) + _EPS
    frac = float(jnp.mean((err > tol).astype(jnp.float32)))
    assert frac <= 5e-3, f"PyTorch-ref mismatch fraction {frac}: {label}"
    assert bool(jnp.all(err <= scale / 3.0 + tol)), f"PyTorch-ref step bound: {label}"


if __name__ == "__main__":
    key = jax.random.PRNGKey(0)
    activity_threshold = 0.5      # matches nn.Parameter(torch.tensor(0.5))

    cases = [
        ((2, 4, 16, 16), jnp.float32),   # shipped case: D=16 -> lane-packed path
        ((2, 4, 10, 16), jnp.float32),   # packed path, tiny row count
        ((2, 4, 5, 128), jnp.float32),   # rows path, ragged final grid block (no pad)
        ((3, 5, 16),     jnp.float32),   # D=16 but rows % 8 != 0 -> rows fallback
        ((4, 33, 16),    jnp.bfloat16),  # bf16 I/O, rows path, ragged final block
    ]
    for i, (shape, dtype) in enumerate(cases):
        x = jax.random.normal(jax.random.fold_in(key, i), shape,
                              dtype=jnp.float32).astype(dtype)
        y = jax.block_until_ready(
            temporal_adaptive_quantize(x, activity_threshold))
        assert y.shape == x.shape and y.dtype == x.dtype
        _check(x, y, activity_threshold, f"shape={shape} dtype={dtype}")

    print("KERNEL_OK")
</pallas_src>

<mosaic_0001>
module attributes {stable_mosaic.version = 11 : i64} {
  func.func @_taq_packed_kernel(%arg0: i32, %arg1: memref<2xf32, #tpu.memory_space<smem>>, %arg2: memref<16x128xf32, #tpu.memory_space<vmem>>, %arg3: memref<16x128xf32, #tpu.memory_space<vmem>>) attributes {dimension_semantics = [#tpu.dimension_semantics<parallel>], iteration_bounds = array<i64: 1>, scalar_prefetch = 1 : i64, scratch_operands = 0 : i64, tpu.core_type = #tpu.core_type<tc>, window_params = [{transform_indices = @transform_0, window_bounds = array<i64: 16, 128>}, {transform_indices = @transform_1, window_bounds = array<i64: 16, 128>}]} {
    %c0 = arith.constant 0 : index
    %c0_0 = arith.constant 0 : index
    %0 = vector.load %arg2[%c0, %c0_0] : memref<16x128xf32, #tpu.memory_space<vmem>>, vector<16x128xf32>
    %1 = math.absf %0 : vector<16x128xf32>
    %2 = tpu.iota {dimensions = array<i32: 0>} : vector<128x128xi32>
    %3 = tpu.iota {dimensions = array<i32: 1>} : vector<128x128xi32>
    %c4_i32 = arith.constant 4 : i32
    %4 = vector.broadcast %c4_i32 : i32 to vector<128x128xi32>
    %5 = arith.shrsi %2, %4 : vector<128x128xi32>
    %c4_i32_1 = arith.constant 4 : i32
    %6 = vector.broadcast %c4_i32_1 : i32 to vector<128x128xi32>
    %7 = arith.shrsi %3, %6 : vector<128x128xi32>
    %8 = arith.cmpi eq, %5, %7 : vector<128x128xi32>
    %9 = arith.extui %8 : vector<128x128xi1> to vector<128x128xi32>
    %10 = arith.sitofp %9 : vector<128x128xi32> to vector<128x128xf32>
    %cst = arith.constant dense<0.000000e+00> : vector<16x128xf32>
    %11 = tpu.matmul %1, %10, %cst {dimension_numbers = #tpu.dot_dimension_numbers<[1], [0], [0], [1], [0, 0, 1, 1], [], []>, precision = #tpu.contract_precision<fp32>} : vector<16x128xf32>, vector<128x128xf32>, vector<16x128xf32> -> vector<16x128xf32>
    %12 = tpu.iota {dimensions = array<i32: 1>} : vector<1x128xi32>
    %c1_i32 = arith.constant 1 : i32
    %13 = vector.broadcast %c1_i32 : i32 to vector<1x128xi32>
    %14 = arith.andi %12, %13 : vector<1x128xi32>
    %c0_i32 = arith.constant 0 : i32
    %15 = vector.broadcast %c0_i32 : i32 to vector<1x128xi32>
    %16 = arith.cmpi eq, %14, %15 : vector<1x128xi32>
    %c127_i32 = arith.constant 127 : i32
    %17 = tpu.dynamic_rotate %1 by %c127_i32 dim 1 : vector<16x128xf32>, i32 -> vector<16x128xf32>
    %c1_i32_2 = arith.constant 1 : i32
    %18 = tpu.dynamic_rotate %1 by %c1_i32_2 dim 1 : vector<16x128xf32>, i32 -> vector<16x128xf32>
    %19 = vector.shape_cast %16 : vector<1x128xi1> to vector<1x128xi1>
    %20 = vector.broadcast %19 : vector<1x128xi1> to vector<16x128xi1>
    %21 = arith.select %20, %17, %18 : vector<16x128xi1>, vector<16x128xf32>
    %22 = arith.maximumf %1, %21 : vector<16x128xf32>
    %c2_i32 = arith.constant 2 : i32
    %23 = vector.broadcast %c2_i32 : i32 to vector<1x128xi32>
    %24 = arith.andi %12, %23 : vector<1x128xi32>
    %c0_i32_3 = arith.constant 0 : i32
    %25 = vector.broadcast %c0_i32_3 : i32 to vector<1x128xi32>
    %26 = arith.cmpi eq, %24, %25 : vector<1x128xi32>
    %c126_i32 = arith.constant 126 : i32
    %27 = tpu.dynamic_rotate %22 by %c126_i32 dim 1 : vector<16x128xf32>, i32 -> vector<16x128xf32>
    %c2_i32_4 = arith.constant 2 : i32
    %28 = tpu.dynamic_rotate %22 by %c2_i32_4 dim 1 : vector<16x128xf32>, i32 -> vector<16x128xf32>
    %29 = vector.shape_cast %26 : vector<1x128xi1> to vector<1x128xi1>
    %30 = vector.broadcast %29 : vector<1x128xi1> to vector<16x128xi1>
    %31 = arith.select %30, %27, %28 : vector<16x128xi1>, vector<16x128xf32>
    %32 = arith.maximumf %22, %31 : vector<16x128xf32>
    %c4_i32_5 = arith.constant 4 : i32
    %33 = vector.broadcast %c4_i32_5 : i32 to vector<1x128xi32>
    %34 = arith.andi %12, %33 : vector<1x128xi32>
    %c0_i32_6 = arith.constant 0 : i32
    %35 = vector.broadcast %c0_i32_6 : i32 to vector<1x128xi32>
    %36 = arith.cmpi eq, %34, %35 : vector<1x128xi32>
    %c124_i32 = arith.constant 124 : i32
    %37 = tpu.dynamic_rotate %32 by %c124_i32 dim 1 : vector<16x128xf32>, i32 -> vector<16x128xf32>
    %c4_i32_7 = arith.constant 4 : i32
    %38 = tpu.dynamic_rotate %32 by %c4_i32_7 dim 1 : vector<16x128xf32>, i32 -> vector<16x128xf32>
    %39 = vector.shape_cast %36 : vector<1x128xi1> to vector<1x128xi1>
    %40 = vector.broadcast %39 : vector<1x128xi1> to vector<16x128xi1>
    %41 = arith.select %40, %37, %38 : vector<16x128xi1>, vector<16x128xf32>
    %42 = arith.maximumf %32, %41 : vector<16x128xf32>
    %c8_i32 = arith.constant 8 : i32
    %43 = vector.broadcast %c8_i32 : i32 to vector<1x128xi32>
    %44 = arith.andi %12, %43 : vector<1x128xi32>
    %c0_i32_8 = arith.constant 0 : i32
    %45 = vector.broadcast %c0_i32_8 : i32 to vector<1x128xi32>
    %46 = arith.cmpi eq, %44, %45 : vector<1x128xi32>
    %c120_i32 = arith.constant 120 : i32
    %47 = tpu.dynamic_rotate %42 by %c120_i32 dim 1 : vector<16x128xf32>, i32 -> vector<16x128xf32>
    %c8_i32_9 = arith.constant 8 : i32
    %48 = tpu.dynamic_rotate %42 by %c8_i32_9 dim 1 : vector<16x128xf32>, i32 -> vector<16x128xf32>
    %49 = vector.shape_cast %46 : vector<1x128xi1> to vector<1x128xi1>
    %50 = vector.broadcast %49 : vector<1x128xi1> to vector<16x128xi1>
    %51 = arith.select %50, %47, %48 : vector<16x128xi1>, vector<16x128xf32>
    %52 = arith.maximumf %42, %51 : vector<16x128xf32>
    %c1 = arith.constant 1 : index
    %53 = memref.load %arg1[%c1] : memref<2xf32, #tpu.memory_space<smem>>
    %cst_10 = arith.constant 6.250000e-02 : f32
    %54 = arith.mulf %53, %cst_10 : f32
    %55 = vector.broadcast %54 : f32 to vector<16x128xf32>
    %56 = arith.mulf %11, %55 : vector<16x128xf32>
    %57 = arith.negf %56 : vector<16x128xf32>
    %58 = math.exp %57 : vector<16x128xf32>
    %cst_11 = arith.constant 1.000000e+00 : f32
    %59 = vector.broadcast %cst_11 : f32 to vector<16x128xf32>
    %60 = arith.addf %59, %58 : vector<16x128xf32>
    %61 = arith.divf %59, %60 : vector<16x128xf32>
    %cst_12 = arith.constant 8.000000e+00 : f32
    %62 = vector.broadcast %cst_12 : f32 to vector<16x128xf32>
    %63 = arith.mulf %62, %61 : vector<16x128xf32>
    %cst_13 = arith.constant 2.000000e+00 : f32
    %cst_14 = arith.constant 8.000000e+00 : f32
    %64 = vector.broadcast %cst_13 : f32 to vector<16x128xf32>
    %65 = arith.maximumf %64, %63 : vector<16x128xf32>
    %66 = vector.broadcast %cst_14 : f32 to vector<16x128xf32>
    %67 = arith.minimumf %66, %65 : vector<16x128xf32>
    %68 = math.roundeven %67 : vector<16x128xf32>
    %69 = arith.fptosi %68 : vector<16x128xf32> to vector<16x128xi32>
    %c127_i32_15 = arith.constant 127 : i32
    %70 = vector.broadcast %c127_i32_15 : i32 to vector<16x128xi32>
    %71 = arith.addi %69, %70 : vector<16x128xi32>
    %c23_i32 = arith.constant 23 : i32
    %72 = vector.broadcast %c23_i32 : i32 to vector<16x128xi32>
    %73 = arith.shli %71, %72 : vector<16x128xi32>
    %74 = tpu.bitcast %73 : vector<16x128xi32> -> vector<16x128xf32>
    %cst_16 = arith.constant 1.000000e+00 : f32
    %75 = vector.broadcast %cst_16 : f32 to vector<16x128xf32>
    %76 = arith.subf %74, %75 : vector<16x128xf32>
    %cst_17 = arith.constant 9.99999974E-6 : f32
    %77 = vector.broadcast %cst_17 : f32 to vector<16x128xf32>
    %78 = arith.addf %52, %77 : vector<16x128xf32>
    %79 = arith.divf %76, %78 : vector<16x128xf32>
    %80 = arith.divf %78, %76 : vector<16x128xf32>
    %81 = arith.mulf %0, %79 : vector<16x128xf32>
    %82 = math.roundeven %81 : vector<16x128xf32>
    %83 = arith.mulf %82, %80 : vector<16x128xf32>
    %c0_18 = arith.constant 0 : index
    %c0_19 = arith.constant 0 : index
    %84 = vector.load %arg3[%c0_18, %c0_19] : memref<16x128xf32, #tpu.memory_space<vmem>>, vector<16x128xf32>
    tpu.vector_store %arg3[%c0_18, %c0_19], %83 {strides = array<i32>} : memref<16x128xf32, #tpu.memory_space<vmem>>, vector<16x128xf32>,
    return
  }
  func.func @transform_0(%arg0: i32, %arg1: memref<2xf32, #tpu.memory_space<smem>>) -> (i32, i32) {
    %c0_i32 = arith.constant 0 : i32
    %c0_i32_0 = arith.constant 0 : i32
    return %arg0, %c0_i32 : i32, i32
  }
  func.func @transform_1(%arg0: i32, %arg1: memref<2xf32, #tpu.memory_space<smem>>) -> (i32, i32) {
    %c0_i32 = arith.constant 0 : i32
    %c0_i32_0 = arith.constant 0 : i32
    return %arg0, %c0_i32 : i32, i32
  }
}

</mosaic_0001>

<bundles_post_ra>
// kernel: tpu_custom_call.1
= control target key start
LH: loop header
LB: loop body
LE: loop exit
PB: predicated region body
PF: predicated region fallthrough
CT: control target
= control target key end

     0   :  { %s2179_s0 = inlined_call_operand.hbm [shape: f32[2], index: 0, kind: input, shape index: {}]   ;;  %s2180_s1 = inlined_call_operand.hbm [shape: f32[16,128], index: 1, kind: input, shape index: {}]   ;;  %s2181_s2 = inlined_call_operand.hbm [shape: f32[16,128], index: 2, kind: output, shape index: {}]  }
   0x1   :  { %s1559_s11 = scalar_lea.hbm %s2179_s0, 16 }
   0x2   :  { %p1560_p0 = scmp.ne.s32.totalorder %s2179_s0, %s1559_s11  ;;  %p1563_p1 = scmp.lt.u32.totalorder %s1559_s11, %s2179_s0 }
   0x4   :  { %p1565_p2 = pnand %p1563_p1, %p1560_p0 }
   0x6   :  { %1568 = shalt.err (!%p1565_p2)  }
   0x7   :  { %s1619_s16 = smov [#allocation3]  }
   0x8   :  { %8 = dma.hbm_to_smem %s2179_s0, 16, %s1619_s16, [#allocation2] }
   0x9   :  { %1613 = dma.done.wait [#allocation2], 16 }
   0xa   :  { %1614 = vsyncadd [#allocation2], 4294967280 }
   0xb   :  { %10 = sfence }
   0xc   :  { %11 = vsyncpa [#allocation5], 0 }
   0xd   :  { %12 = vsyncpa [#allocation6], 0  ;;  %s1620_s19 = smov [#allocation4]   ;;  %s1569_s23 = scalar_lea.hbm %s2180_s1, 256 }
   0xe   :  { %s18_s20 = sshll.u32 %s1620_s19, 4  ;;  %p1570_p3 = scmp.ne.s32.totalorder %s2180_s1, %s1569_s23  ;;  %s19_s20 = int_to_ptr.vmem [resolvable:$true] %s18_s20 }
   0xf   :  { %p1573_p4 = scmp.lt.u32.totalorder %s1569_s23, %s2180_s1 }
  0x11   :  { %p1575_p5 = pnand %p1573_p4, %p1570_p3 }
  0x13   :  { %1578 = shalt.err (!%p1575_p5)
}
  0x14   :  { %s1579_s0 = scalar_lea.vmem %s19_s20, 256  ;;  %p1584_p7 = scmp.lt.s32.totalorder %s19_s20, %s19_s20 }
  0x15   :  { %p1580_p6 = scmp.ne.s32.totalorder %s19_s20, %s1579_s0  ;;  %p1585_p8 = scmp.lt.s32.totalorder %s1579_s0, %s1579_s0 }
  0x17   :  { %p1586_p9 = por %p1585_p8, %p1584_p7 }
  0x19   :  { %p1587_p10 = pnand %p1586_p9, %p1580_p6 }
  0x1b   :  { %1590 = shalt.err (!%p1587_p10)
}
  0x1c   :  { %s1621_s28 = smov 128   ;;  %s1622_s29 = smov 8  }
  0x1d   :  { %24 = dma.hbm_to_vmem [thread:$0]  %s2180_s1, 256, %s19_s20, [#allocation5], %s1621_s28, %s1621_s28, %s1622_s29  }
  0x1e   :  { %1615 = dma.done.wait [#allocation5], 256  }
  0x1f   :  { %1616 = vsyncadd [#allocation5], 4294967040  ;;  %v32_v0 = vlaneseq  ;;  %v1693_v13 = vld [vmem:[#allocation4] sm:$0xff]  ;;  %v1695_v14 = vld [vmem:[#allocation4 + $0x8] sm:$0xff]  ;;  %s1623_s1 = smov 1   ;;  %s1624_s4 = smov 127  }
  0x20   :  { %v1698_v18 = vand.u32 2147483647, %v1693_v13  ;;  %v1728_v25 = vand.u32 2147483647, %v1695_v14  ;;  %v1625_v27 = vmov 1.0|1.0  }
  0x21   :  { %v1675_v1 = vshrl.u32 %v32_v0, 7  ;;  %v1677_v2 = vand.u32 127, %v32_v0  ;;  %v1626_v41 = vmov 0.0   ;;  %s1627_s5 = smov 126   ;;  %s1628_s6 = smov 2  }
  0x22   :  { %806 = vrot.lane.b32.xlu1 %v1698_v18, %s1623_s1  ;;  %802 = vrot.lane.b32.xlu0 %v1698_v18, %s1624_s4  ;;  %v1851_v55 = vand.u32 4294901760, %v1698_v18  ;;  %s1629_s7 = smov 124   ;;  %s1630_s8 = smov 4  }
  0x23   :  { %v34_v3 = vadd.s32 8, %v1675_v1  ;;  %v51_v4 = vshra.s32 %v1675_v1, 4  ;;  %v1682_v5 = vshra.s32 %v1677_v2, 4  ;;  %v35_v6 = vadd.s32 16, %v1675_v1  ;;  %s1631_s9 = smov 120   ;;  %s996_s10 = sld [smem:[#allocation3 + $0x1]] }
  0x24   :  { %v36_v7 = vadd.s32 24, %v1675_v1  ;;  %v37_v8 = vadd.s32 32, %v1675_v1  ;;  %v38_v9 = vadd.s32 40, %v1675_v1  ;;  %v39_v20 = vadd.s32 48, %v1675_v1  ;;  %s1632_s12 = smov [#allocation7]  }
  0x25   :  { %v52_v10 = vshra.s32 %v34_v3, 4  ;;  %vm1689_vm0 = vcmp.eq.s32.totalorder %v51_v4, %v1682_v5  ;;  %v53_v12 = vshra.s32 %v35_v6, 4  ;;  %v40_v21 = vadd.s32 56, %v1675_v1  ;;  %s920_s13 = sshll.u32 %s1632_s12, 4  ;;  %s921_s13 = int_to_ptr.vmem [resolvable:$true] %s920_s13 }
  0x26   :  { %v54_v15 = vshra.s32 %v36_v7, 4  ;;  %v55_v16 = vshra.s32 %v37_v8, 4  ;;  %v56_v17 = vshra.s32 %v38_v9, 4  ;;  %v57_v30 = vshra.s32 %v39_v20, 4  ;;  %808 = vrot.lane.b32.xlu1 %v1728_v25, %s1623_s1  ;;  %804 = vrot.lane.b32.xlu0 %v1728_v25, %s1624_s4  ;;  %s1591_s14 = scalar_lea.vmem %s921_s13, 256  ;;  %p1596_p12 = scmp.lt.s32.totalorder %s921_s13, %s921_s13 }
  0x27   :  { %vm1701_vm1 = vcmp.eq.s32.totalorder %v52_v10, %v1682_v5  ;;  %vm1716_vm3 = vcmp.eq.s32.totalorder %v53_v12, %v1682_v5  ;;  %v58_v31 = vshra.s32 %v40_v21, 4  ;;  %v41_v32 = vadd.s32 64, %v1675_v1  ;;  %p1592_p11 = scmp.ne.s32.totalorder %s921_s13, %s1591_s14  ;;  %p1597_p13 = scmp.lt.s32.totalorder %s1591_s14, %s1591_s14 }
  0x28   :  { %vm1711_vm2 = vmpackc.low %vm1701_vm1, %vm1689_vm0  ;;  %vm1721_vm4 = vcmp.eq.s32.totalorder %v54_v15, %v1682_v5  ;;  %vm1745_vm6 = vcmp.eq.s32.totalorder %v55_v16, %v1682_v5  ;;  %vm1750_vm7 = vcmp.eq.s32.totalorder %v56_v17, %v1682_v5  ;;  %v42_v33 = vadd.s32 72, %v1675_v1 }
  0x29   :  { %vm1734_vm5 = vmpackc.low %vm1721_vm4, %vm1716_vm3  ;;  %1320 = vmatprep.subr.msk.bf16.mxu1 %vm1711_vm2, %v1625_v27  ;;  %1416 = vmatprep.subr.msk.bf16.mxu0 %vm1711_vm2, %v1625_v27  ;;  %v43_v35 = vadd.s32 80, %v1675_v1  ;;  %v44_v36 = vadd.s32 88, %v1675_v1  ;;  %vm1781_vm9 = vcmp.eq.s32.totalorder %v57_v30, %v1682_v5  ;;  %vm1786_vm10 = vcmp.eq.s32.totalorder %v58_v31, %v1682_v5  ;;  %s865_s11 = smul.f32 0.0625, %s996_s10  ;;  %p1598_p0 = por %p1597_p13, %p1596_p12 }
  0x2a   :  { %1322 = vmatpush3.bf16.msk.msra.mxu1 %vm1711_vm2, %v1625_v27  ;;  %1418 = vmatpush3.bf16.msk.msra.mxu0 %vm1711_vm2, %v1625_v27  ;;  %vm1774_vm8 = vmpackc.low %vm1750_vm7, %vm1745_vm6  ;;  %v59_v39 = vshra.s32 %v41_v32, 4  ;;  %v60_v40 = vshra.s32 %v42_v33, 4  ;;  %v932_v42 = vsel %vm1689_vm0, 1.0, %v1626_v41  ;;  %v933_v43 = vsel %vm1701_vm1, 1.0, %v1626_v41 }
  0x2b   :  { %1324 = vmatprep.subr.msk.bf16.mxu1 %vm1734_vm5, %v1625_v27  ;;  %1420 = vmatprep.subr.msk.bf16.mxu0 %vm1734_vm5, %v1625_v27  ;;  %vm1812_vm11 = vmpackc.low %vm1786_vm10, %vm1781_vm9  ;;  %v61_v45 = vshra.s32 %v43_v35, 4  ;;  %v45_v46 = vadd.s32 96, %v1675_v1  ;;  %v46_v47 = vadd.s32 104, %v1675_v1  ;;  %v62_v50 = vshra.s32 %v44_v36, 4  ;;  %p1599_p1 = pnand %p1598_p0, %p1592_p11 }
  0x2c   :  { %vm1819_vm12 = vcmp.eq.s32.totalorder %v59_v39, %v1682_v5  ;;  %vm1824_vm13 = vcmp.eq.s32.totalorder %v60_v40, %v1682_v5  ;;  %v1828_v51 = vsub.f32 %v932_v42, %v932_v42  ;;  %v1830_v52 = vsub.f32 %v933_v43, %v933_v43 }
  0x2d   :  { %v934_v53 = vsel %vm1716_vm3, 1.0, %v1626_v41  ;;  %v935_v54 = vsel %vm1721_vm4, 1.0, %v1626_v41  ;;  %v936_v56 = vsel %vm1745_vm6, 1.0, %v1626_v41  ;;  %vm1860_vm14 = vmpackc.low %vm1824_vm13, %vm1819_vm12  ;;  %vm1865_vm15 = vcmp.eq.s32.totalorder %v61_v45, %v1682_v5 }
  0x2e   :  { %1326 = vmatpush3.bf16.msk.msra.mxu1 %vm1734_vm5, %v1625_v27  ;;  %1422 = vmatpush3.bf16.msk.msra.mxu0 %vm1734_vm5, %v1625_v27  ;;  %v63_v59 = vshra.s32 %v45_v46, 4  ;;  %v64_v60 = vshra.s32 %v46_v47, 4  ;;  %vm1870_vm0 = vcmp.eq.s32.totalorder %v62_v50, %v1682_v5  ;;  %v47_v62 = vadd.s32 112, %v1675_v1 }
  0x2f   :  { %1328 = vmatprep.subr.msk.bf16.mxu1 %vm1774_vm8, %v1625_v27  ;;  %1424 = vmatprep.subr.msk.bf16.mxu0 %vm1774_vm8, %v1625_v27  ;;  %v48_v63 = vadd.s32 120, %v1675_v1  ;;  %v1878_v0 = vsub.f32 %v1698_v18, %v1851_v55  ;;  %v220_v3 = vand.u32 4294901760, %v1828_v51  ;;  %v227_v4 = vand.u32 4294901760, %v1830_v52  ;;  %vm1914_vm1 = vmpackc.low %vm1870_vm0, %vm1865_vm15 }
  0x30   :  { %v1889_v6 = vand.u32 4294901760, %v1728_v25  ;;  %v1891_v1 = vsub.f32 %v934_v53, %v934_v53  ;;  %v1893_v7 = vsub.f32 %v935_v54, %v935_v54  ;;  %v937_v8 = vsel %vm1750_vm7, 1.0, %v1626_v41 }
  0x31   :  { %v199_v9 = vand.u32 4294901760, %v1878_v0  ;;  %v1905_v10 = vsub.f32 %v936_v56, %v936_v56  ;;  %v938_v11 = vsel %vm1781_vm9, 1.0, %v1626_v41  ;;  %vm1919_vm3 = vcmp.eq.s32.totalorder %v63_v59, %v1682_v5 }
  0x32   :  { %1330 = vmatpush3.bf16.msk.msra.mxu1 %vm1774_vm8, %v1625_v27  ;;  %1426 = vmatpush3.bf16.msk.msra.mxu0 %vm1774_vm8, %v1625_v27  ;;  %vm1924_vm4 = vcmp.eq.s32.totalorder %v64_v60, %v1682_v5  ;;  %v65_v17 = vshra.s32 %v47_v62, 4  ;;  %v66_v19 = vshra.s32 %v48_v63, 4  ;;  %v1931_v21 = vsub.f32 %v1728_v25, %v1889_v6 }
  0x33   :  { %1332 = vmatprep.subr.msk.bf16.mxu1 %vm1812_vm11, %v1625_v27  ;;  %1428 = vmatprep.subr.msk.bf16.mxu0 %vm1812_vm11, %v1625_v27  ;;  %v200_v20 = vsub.f32 %v1878_v0, %v199_v9  ;;  %v1933_v23 = vsub.f32 %v937_v8, %v937_v8  ;;  %v221_v24 = vsub.f32 %v1828_v51, %v220_v3  ;;  %v234_v30 = vand.u32 4294901760, %v1891_v1  ;;  %vm1963_vm6 = vmpackc.low %vm1924_vm4, %vm1919_vm3 }
  0x34   :  { %1246 = vmatprep.mubr.f32.mxu0 %v199_v9  ;;  %v228_v28 = vsub.f32 %v1830_v52, %v227_v4  ;;  %v241_v31 = vand.u32 4294901760, %v1893_v7  ;;  %v939_v32 = vsel %vm1786_vm10, 1.0, %v1626_v41  ;;  %v1954_v33 = vsub.f32 %v938_v11, %v938_v11 }
  0x35   :  { %v201_v29 = vand.u32 4294901760, %v200_v20  ;;  %v940_v35 = vsel %vm1819_vm12, 1.0, %v1626_v41  ;;  %v941_v37 = vsel %vm1824_vm13, 1.0, %v1626_v41  ;;  %vm1971_vm7 = vcmp.eq.s32.totalorder %v65_v17, %v1682_v5 }
  0x36   :  { %1334 = vmatpush3.bf16.msk.msra.mxu1 %vm1812_vm11, %v1625_v27  ;;  %1430 = vmatpush3.bf16.msk.msra.mxu0 %vm1812_vm11, %v1625_v27  ;;  %vm1976_vm9 = vcmp.eq.s32.totalorder %v66_v19, %v1682_v5  ;;  %v209_v40 = vand.u32 4294901760, %v1931_v21  ;;  %v222_v42 = vand.u32 4294901760, %v221_v24  ;;  %v229_v43 = vand.u32 4294901760, %v228_v28 }
  0x37   :  { %1336 = vmatprep.subr.msk.bf16.mxu1 %vm1860_vm14, %v1625_v27  ;;  %1432 = vmatprep.subr.msk.bf16.mxu0 %vm1860_vm14, %v1625_v27  ;;  %v248_v45 = vand.u32 4294901760, %v1905_v10  ;;  %v255_v5 = vand.u32 4294901760, %v1933_v23  ;;  %v1989_v46 = vsub.f32 %v939_v32, %v939_v32  ;;  %v235_v47 = vsub.f32 %v1891_v1, %v234_v30  ;;  %vm2007_vm10 = vmpackc.low %vm1976_vm9, %vm1971_vm7 }
  0x38   :  { %1141 = vmatprep.mubr.f32.mxu1 %v201_v29  ;;  %v242_v48 = vsub.f32 %v1893_v7, %v241_v31  ;;  %v1999_v49 = vsub.f32 %v940_v35, %v940_v35  ;;  %v2001_v50 = vsub.f32 %v941_v37, %v941_v37  ;;  %v942_v54 = vsel %vm1865_vm15, 1.0, %v1626_v41 }
  0x39   :  { %v943_v56 = vsel %vm1870_vm0, 1.0, %v1626_v41  ;;  %v1447_v59 = vpack.c.bf16 %v227_v4, %v220_v3  ;;  %v210_v60 = vsub.f32 %v1931_v21, %v209_v40  ;;  %v1351_v62 = vpack.c.bf16 %v229_v43, %v222_v42 }
  0x3a   :  { %1338 = vmatpush3.bf16.msk.msra.mxu1 %vm1860_vm14, %v1625_v27  ;;  %1434 = vmatpush3.bf16.msk.msra.mxu0 %vm1860_vm14, %v1625_v27  ;;  %v249_v63 = vsub.f32 %v1905_v10, %v248_v45  ;;  %v256_v58 = vsub.f32 %v1933_v23, %v255_v5  ;;  %v236_v61 = vand.u32 4294901760, %v235_v47  ;;  %v243_v3 = vand.u32 4294901760, %v242_v48 }
  0x3b   :  { %1340 = vmatprep.subr.msk.bf16.mxu1 %vm1914_vm1, %v1625_v27  ;;  %1436 = vmatprep.subr.msk.bf16.mxu0 %vm1914_vm1, %v1625_v27  ;;  %v262_v4 = vand.u32 4294901760, %v1954_v33  ;;  %v269_v8 = vand.u32 4294901760, %v1989_v46  ;;  %v2034_v9 = vsub.f32 %v942_v54, %v942_v54  ;;  %v2036_v11 = vsub.f32 %v943_v56, %v943_v56 }
  0x3c   :  { %v944_v17 = vsel %vm1919_vm3, 1.0, %v1626_v41  ;;  %v945_v19 = vsel %vm1924_vm4, 1.0, %v1626_v41  ;;  %v211_v20 = vand.u32 4294901760, %v210_v60  ;;  %v1451_v24 = vpack.c.bf16 %v241_v31, %v234_v30 }
  0x3d   :  { %v250_v28 = vand.u32 4294901760, %v249_v63  ;;  %v257_v29 = vand.u32 4294901760, %v256_v58  ;;  %v276_v32 = vand.u32 4294901760, %v1999_v49  ;;  %v283_v15 = vand.u32 4294901760, %v2001_v50 }
  0x3e   :  { %1342 = vmatpush3.bf16.msk.msra.mxu1 %vm1914_vm1, %v1625_v27  ;;  %1438 = vmatpush3.bf16.msk.msra.mxu0 %vm1914_vm1, %v1625_v27  ;;  %v1355_v16 = vpack.c.bf16 %v243_v3, %v236_v61  ;;  %v263_v35 = vsub.f32 %v1954_v33, %v262_v4  ;;  %v270_v30 = vsub.f32 %v1989_v46, %v269_v8  ;;  %v946_v42 = vsel %vm1971_vm7, 1.0, %v1626_v41 }
  0x3f   :  { %1344 = vmatprep.subr.msk.bf16.mxu1 %vm1963_vm6, %v1625_v27  ;;  %1440 = vmatprep.subr.msk.bf16.mxu0 %vm1963_vm6, %v1625_v27  ;;  %v2054_v31 = vsub.f32 %v944_v17, %v944_v17  ;;  %v2056_v37 = vsub.f32 %v945_v19, %v945_v19  ;;  %v1455_v43 = vpack.c.bf16 %v255_v5, %v248_v45  ;;  %v947_v47 = vsel %vm1976_vm9, 1.0, %v1626_v41 }
  0x40   :  { %v1359_v48 = vpack.c.bf16 %v257_v29, %v250_v28  ;;  %v277_v54 = vsub.f32 %v1999_v49, %v276_v32  ;;  %v284_v56 = vsub.f32 %v2001_v50, %v283_v15  ;;  %v264_v60 = vand.u32 4294901760, %v263_v35 }
  0x41   :  { %v271_v63 = vand.u32 4294901760, %v270_v30  ;;  %v290_v38 = vand.u32 4294901760, %v2034_v9  ;;  %v2070_v41 = vsub.f32 %v946_v42, %v946_v42  ;;  %v2072_v39 = vsub.f32 %v947_v47, %v947_v47 }
  0x42   :  { %1346 = vmatpush3.bf16.msk.msra.mxu1 %vm1963_vm6, %v1625_v27  ;;  %1442 = vmatpush3.bf16.msk.msra.mxu0 %vm1963_vm6, %v1625_v27  ;;  %v1459_v45 = vpack.c.bf16 %v269_v8, %v262_v4  ;;  %v278_v5 = vand.u32 4294901760, %v277_v54  ;;  %v311_v58 = vand.u32 4294901760, %v2056_v37  ;;  %v1463_v19 = vpack.c.bf16 %v283_v15, %v276_v32 }
  0x43   :  { %1348 = vmatprep.subr.msk.bf16.mxu1 %vm2007_vm10, %v1625_v27  ;;  %1444 = vmatprep.subr.msk.bf16.mxu0 %vm2007_vm10, %v1625_v27  ;;  %v1363_v61 = vpack.c.bf16 %v271_v63, %v264_v60  ;;  %v291_v3 = vsub.f32 %v2034_v9, %v290_v38  ;;  %v318_v29 = vand.u32 4294901760, %v2070_v41  ;;  %v1395_v22 = vpack.c.bf16 %v1989_v46, %v1954_v33 }
  0x44   :  { %v312_v8 = vsub.f32 %v2056_v37, %v311_v58  ;;  %v1399_v26 = vpack.c.bf16 %v2001_v50, %v1999_v49  ;;  %v1403_v34 = vpack.c.bf16 %v2036_v11, %v2034_v9  ;;  %v1407_v44 = vpack.c.bf16 %v2056_v37, %v2054_v31 }
  0x45   :  { %v319_v42 = vsub.f32 %v2070_v41, %v318_v29 }
  0x46   :  { %1350 = vmatpush3.bf16.msk.msra.mxu1 %vm2007_vm10, %v1625_v27  ;;  %1446 = vmatpush3.bf16.msk.msra.mxu0 %vm2007_vm10, %v1625_v27  ;;  %v313_v15 = vand.u32 4294901760, %v312_v8 }
  0x47   :  { %1352 = vmatprep.subr.bf16.mxu1 %v1351_v62  ;;  %1448 = vmatprep.subr.bf16.mxu0 %v1447_v59  ;;  %v320_v54 = vand.u32 4294901760, %v319_v42 }
  0x49   :  { %1142 = vmatmul.mubr.f32.vlgmr.msra.gmra.mrb[0].mxu1 %v211_v20  ;;  %1247 = vmatmul.mubr.f32.vlgmr.msra.gmra.mrb[0].mxu0 %v209_v40  ;;  %v297_v40 = vand.u32 4294901760, %v2036_v11 }
  0x4a   :  { %1354 = vmatpush3.bf16.msra.mxu1 %v1351_v62  ;;  %1450 = vmatpush3.bf16.msra.mxu0 %v1447_v59  ;;  %v285_v59 = vand.u32 4294901760, %v284_v56  ;;  %v304_v62 = vand.u32 4294901760, %v2054_v31 }
  0x4b   :  { %1356 = vmatprep.subr.bf16.mxu1 %v1355_v16  ;;  %1452 = vmatprep.subr.bf16.mxu0 %v1451_v24  ;;  %v298_v17 = vsub.f32 %v2036_v11, %v297_v40  ;;  %v1467_v35 = vpack.c.bf16 %v297_v40, %v290_v38  ;;  %v1383_v38 = vpack.c.bf16 %v1830_v52, %v1828_v51 }
  0x4c   :  { %1176 = vmatprep.mubr.f32.mxu1 %v1851_v55  ;;  %1281 = vmatprep.mubr.f32.mxu0 %v1851_v55  ;;  %v1367_v20 = vpack.c.bf16 %v285_v59, %v278_v5  ;;  %v305_v4 = vsub.f32 %v2054_v31, %v304_v62  ;;  %v1387_v40 = vpack.c.bf16 %v1893_v7, %v1891_v1 }
  0x4d   :  { %v299_v28 = vand.u32 4294901760, %v298_v17  ;;  %v1391_v51 = vpack.c.bf16 %v1933_v23, %v1905_v10  ;;  %v1411_v52 = vpack.c.bf16 %v2072_v39, %v2070_v41 }
  0x4e   :  { %1358 = vmatpush3.bf16.msra.mxu1 %v1355_v16  ;;  %1454 = vmatpush3.bf16.msra.mxu0 %v1451_v24  ;;  %v292_v24 = vand.u32 4294901760, %v291_v3  ;;  %v325_v16 = vand.u32 4294901760, %v2072_v39  ;;  %v306_v30 = vand.u32 4294901760, %v305_v4 }
  0x4f   :  { %1360 = vmatprep.subr.bf16.mxu1 %v1359_v48  ;;  %1456 = vmatprep.subr.bf16.mxu0 %v1455_v43 }
  0x50   :  { %v1371_v32 = vpack.c.bf16 %v299_v28, %v292_v24  ;;  %v1375_v47 = vpack.c.bf16 %v313_v15, %v306_v30  ;;  %v1475_v63 = vpack.c.bf16 %v325_v16, %v318_v29 }
  0x52   :  { %1362 = vmatpush3.bf16.msra.mxu1 %v1359_v48  ;;  %1458 = vmatpush3.bf16.msra.mxu0 %v1455_v43  ;;  %v326_v43 = vsub.f32 %v2072_v39, %v325_v16  ;;  %v1471_v48 = vpack.c.bf16 %v311_v58, %v304_v62  ;;  %v832_v39 = vand.u32 4, %v1677_v2 }
  0x53   :  { %1364 = vmatprep.subr.bf16.mxu1 %v1363_v61  ;;  %1460 = vmatprep.subr.bf16.mxu0 %v1459_v45 }
  0x54   :  { %v327_v56 = vand.u32 4294901760, %v326_v43 }
  0x56   :  { %1366 = vmatpush3.bf16.msra.mxu1 %v1363_v61  ;;  %1462 = vmatpush3.bf16.msra.mxu0 %v1459_v45  ;;  %v1379_v60 = vpack.c.bf16 %v327_v56, %v320_v54 }
  0x57   :  { %1368 = vmatprep.subr.bf16.mxu1 %v1367_v20  ;;  %1464 = vmatprep.subr.bf16.mxu0 %v1463_v19 }
  0x5a   :  { %1370 = vmatpush3.bf16.msra.mxu1 %v1367_v20  ;;  %1466 = vmatpush3.bf16.msra.mxu0 %v1463_v19  ;;  %v866_v19 = vstv %s865_s11 }
  0x5b   :  { %1372 = vmatprep.subr.bf16.mxu1 %v1371_v32  ;;  %1468 = vmatprep.subr.bf16.mxu0 %v1467_v35 }
  0x5e   :  { %1374 = vmatpush3.bf16.msra.mxu1 %v1371_v32  ;;  %1470 = vmatpush3.bf16.msra.mxu0 %v1467_v35 }
  0x5f   :  { %1376 = vmatprep.subr.bf16.mxu1 %v1375_v47  ;;  %1472 = vmatprep.subr.bf16.mxu0 %v1471_v48 }
  0x62   :  { %1378 = vmatpush3.bf16.msra.mxu1 %v1375_v47  ;;  %1474 = vmatpush3.bf16.msra.mxu0 %v1471_v48 }
  0x63   :  { %1380 = vmatprep.subr.bf16.mxu1 %v1379_v60  ;;  %1476 = vmatprep.subr.bf16.mxu0 %v1475_v63 }
  0x66   :  { %1382 = vmatpush3.bf16.msra.mxu1 %v1379_v60  ;;  %1478 = vmatpush3.bf16.msra.mxu0 %v1475_v63  ;;  %v848_v60 = vand.u32 8, %v1677_v2 }
  0x67   :  { %1384 = vmatprep.subr.bf16.mxu1 %v1383_v38  ;;  %1480 = vmatprep.subr.msk.bf16.mxu0 %vm1711_vm2, %v1625_v27 }
  0x69   :  { %1177 = vmatmul.mubr.f32.vlgmr.msra.gmra.mrb[0].mxu1 %v1889_v6  ;;  %1282 = vmatmul.mubr.f32.vlgmr.msra.gmra.mrb[0].mxu0 %v1889_v6 }
  0x6a   :  { %1386 = vmatpush3.bf16.msra.mxu1 %v1383_v38  ;;  %1482 = vmatpush3.bf16.msk.msra.mxu0 %vm1711_vm2, %v1625_v27 }
  0x6b   :  { %1388 = vmatprep.subr.bf16.mxu1 %v1387_v40  ;;  %1484 = vmatprep.subr.msk.bf16.mxu0 %vm1734_vm5, %v1625_v27 }
  0x6c   :  { %1211 = vmatprep.mubr.f32.mxu1 %v1878_v0  ;;  %1316 = vmatprep.mubr.f32.mxu0 %v1851_v55  ;;  %v800_v55 = vand.u32 1, %v1677_v2 }
  0x6e   :  { %1390 = vmatpush3.bf16.msra.mxu1 %v1387_v40  ;;  %1486 = vmatpush3.bf16.msk.msra.mxu0 %vm1734_vm5, %v1625_v27  ;;  %vm801_vm2 = vcmp.eq.s32.totalorder %v800_v55, 0 }
  0x6f   :  { %1392 = vmatprep.subr.bf16.mxu1 %v1391_v51  ;;  %1488 = vmatprep.subr.msk.bf16.mxu0 %vm1774_vm8, %v1625_v27 }
  0x72   :  { %1394 = vmatpush3.bf16.msra.mxu1 %v1391_v51  ;;  %1490 = vmatpush3.bf16.msk.msra.mxu0 %vm1774_vm8, %v1625_v27  ;;  %vm833_vm8 = vcmp.eq.s32.totalorder %v832_v39, 0 }
  0x73   :  { %1396 = vmatprep.subr.bf16.mxu1 %v1395_v22  ;;  %1492 = vmatprep.subr.msk.bf16.mxu0 %vm1812_vm11, %v1625_v27 }
  0x76   :  { %1398 = vmatpush3.bf16.msra.mxu1 %v1395_v22  ;;  %1494 = vmatpush3.bf16.msk.msra.mxu0 %vm1812_vm11, %v1625_v27  ;;  %vm849_vm11 = vcmp.eq.s32.totalorder %v848_v60, 0 }
  0x77   :  { %1400 = vmatprep.subr.bf16.mxu1 %v1399_v26  ;;  %1496 = vmatprep.subr.msk.bf16.mxu0 %vm1860_vm14, %v1625_v27 }
  0x7a   :  { %1402 = vmatpush3.bf16.msra.mxu1 %v1399_v26  ;;  %1498 = vmatpush3.bf16.msk.msra.mxu0 %vm1860_vm14, %v1625_v27 }
  0x7b   :  { %1404 = vmatprep.subr.bf16.mxu1 %v1403_v34  ;;  %1500 = vmatprep.subr.msk.bf16.mxu0 %vm1914_vm1, %v1625_v27 }
  0x7e   :  { %1406 = vmatpush3.bf16.msra.mxu1 %v1403_v34  ;;  %1502 = vmatpush3.bf16.msk.msra.mxu0 %vm1914_vm1, %v1625_v27 }
  0x7f   :  { %1408 = vmatprep.subr.bf16.mxu1 %v1407_v44  ;;  %1504 = vmatprep.subr.msk.bf16.mxu0 %vm1963_vm6, %v1625_v27 }
  0x82   :  { %1410 = vmatpush3.bf16.msra.mxu1 %v1407_v44  ;;  %1506 = vmatpush3.bf16.msk.msra.mxu0 %vm1963_vm6, %v1625_v27 }
  0x83   :  { %1412 = vmatprep.subr.bf16.mxu1 %v1411_v52  ;;  %1508 = vmatprep.subr.msk.bf16.mxu0 %vm2007_vm10, %v1625_v27 }
  0x86   :  { %1414 = vmatpush3.bf16.msra.mxu1 %v1411_v52  ;;  %1510 = vmatpush3.bf16.msk.msra.mxu0 %vm2007_vm10, %v1625_v27  ;;  %v816_v27 = vand.u32 2, %v1677_v2 }
  0x88   :  { %vm817_vm5 = vcmp.eq.s32.totalorder %v816_v27, 0 }
  0x89   :  { %1212 = vmatmul.mubr.f32.vlgmr.msra.gmra.mrb[0].mxu1 %v1931_v21  ;;  %1317 = vmatmul.mubr.f32.vlgmr.msra.gmra.mrb[0].mxu0 %v1889_v6 }
  0x94   :  { %v807_v57 = vpop.permute.xlu1 %806  ;;  %v803_v0 = vpop.permute.xlu0 %802 }
  0x95   :  { %v812_v1 = vsel %vm801_vm2, %v803_v0, %v807_v57 }
  0x96   :  { %v814_v7 = vmax.f32 %v1698_v18, %v812_v1 }
  0x98   :  { %v809_v10 = vpop.permute.xlu1 %808  ;;  %818 = vrot.lane.b32.xlu0 %v814_v7, %s1627_s5  ;;  %v805_v12 = vpop.permute.xlu0 %804 }
  0x99   :  { %v813_v23 = vsel %vm801_vm2, %v805_v12, %v809_v10 }
  0x9a   :  { %v815_v33 = vmax.f32 %v1728_v25, %v813_v23 }
  0x9c   :  { %822 = vrot.lane.b32.xlu0 %v814_v7, %s1628_s6  ;;  %820 = vrot.lane.b32.xlu1 %v815_v33, %s1627_s5 }
  0xa0   :  { %824 = vrot.lane.b32.xlu1 %v815_v33, %s1628_s6 }
 0x10a   :  { %v819_v6 = vpop.permute.xlu0 %818 }
 0x10e   :  { %v821_v21 = vpop.permute.xlu1 %820  ;;  %v823_v36 = vpop.permute.xlu0 %822 }
 0x10f   :  { %v828_v46 = vsel %vm817_vm5, %v819_v6, %v823_v36 }
 0x110   :  { %v830_v49 = vmax.f32 %v814_v7, %v828_v46 }
 0x112   :  { %v825_v18 = vpop.permute.xlu1 %824  ;;  %834 = vrot.lane.b32.xlu0 %v830_v49, %s1629_s7 }
 0x113   :  { %v829_v50 = vsel %vm817_vm5, %v821_v21, %v825_v18 }
 0x114   :  { %v831_v53 = vmax.f32 %v815_v33, %v829_v50 }
 0x116   :  { %836 = vrot.lane.b32.xlu1 %v831_v53, %s1629_s7  ;;  %838 = vrot.lane.b32.xlu0 %v830_v49, %s1630_s8 }
 0x11a   :  { %840 = vrot.lane.b32.xlu1 %v831_v53, %s1630_s8 }
 0x15c   :  { %v1213_v25 = vpop.f32.mrb[0].mxu1  ;;  %v1318_v9 = vpop.f32.mrb[0].mxu0 }
 0x15d   :  { %v1511_v11 = vadd.f32 %v1318_v9, %v1213_v25  ;;  %v474_v31 = vpop.f32.mrb[1].mxu1  ;;  %v790_v37 = vpop.f32.mrb[1].mxu0 }
 0x15e   :  { %v1512_v41 = vadd.f32 %v790_v37, %v474_v31 }
 0x15f   :  { %v868_v8 = vmul.f32 %v1511_v11, %v866_v19 }
 0x160   :  { %v867_v20 = vmul.f32 %v1512_v41, %v866_v19 }
 0x161   :  { %v998_v24 = vmul.f32 -1.442695, %v868_v8 }
 0x162   :  { %v997_v4 = vmul.f32 -1.442695, %v867_v20 }
 0x164   :  { %1543 = vpow2.f32 %v997_v4 }
 0x165   :  { %1545 = vpow2.f32 %v998_v24 }
 0x16e   :  { %v1544_v28 = vpop.eup %1543 }
 0x16f   :  { %v875_v29 = vadd.f32 1.0, %v1544_v28  ;;  %v1546_v16 = vpop.eup %1545 }
 0x170   :  { %v876_v35 = vadd.f32 1.0, %v1546_v16 }
 0x171   :  { %1547 = vrcp.f32 %v875_v29 }
 0x172   :  { %1549 = vrcp.f32 %v876_v35 }
 0x17b   :  { %v1548_v30 = vpop.eup %1547 }
 0x17c   :  { %v881_v32 = vmul.f32 8.0, %v1548_v30  ;;  %v1550_v15 = vpop.eup %1549 }
 0x17d   :  { %v882_v43 = vmul.f32 8.0, %v1550_v15 }
 0x17e   :  { %v883_v42 = vmax.f32 %v881_v32, 2.0 }
 0x17f   :  { %v884_v48 = vmax.f32 %v882_v43, 2.0 }
 0x180   :  { %v885_v47 = vmin.f32 %v883_v42, 8.0 }
 0x181   :  { %v886_v56 = vmin.f32 %v884_v48, 8.0 }
 0x182   :  { %v1523_v54 = vcvt.f32.s32 %v885_v47 }
 0x183   :  { %v1526_v40 = vcvt.f32.s32 %v886_v56 }
 0x184   :  { %v835_v45 = vpop.permute.xlu0 %834  ;;  %v889_v38 = vadd.s32 127, %v1523_v54 }
 0x185   :  { %v890_v44 = vadd.s32 127, %v1526_v40 }
 0x186   :  { %v891_v26 = vshll.u32 %v889_v38, 23 }
 0x187   :  { %v892_v7 = vshll.u32 %v890_v44, 23 }
 0x188   :  { %v837_v5 = vpop.permute.xlu1 %836  ;;  %v839_v59 = vpop.permute.xlu0 %838  ;;  %v999_v0 = vadd.f32 -1.0, %v891_v26 }
 0x189   :  { %v844_v62 = vsel %vm833_vm8, %v835_v45, %v839_v59  ;;  %v1000_v2 = vadd.f32 -1.0, %v892_v7 }
 0x18a   :  { %v846_v58 = vmax.f32 %v830_v49, %v844_v62 }
 0x18c   :  { %v841_v61 = vpop.permute.xlu1 %840  ;;  %850 = vrot.lane.b32.xlu0 %v846_v58, %s1631_s9 }
 0x18d   :  { %v845_v3 = vsel %vm833_vm8, %v837_v5, %v841_v61 }
 0x18e   :  { %v847_v17 = vmax.f32 %v831_v53, %v845_v3 }
 0x190   :  { %852 = vrot.lane.b32.xlu1 %v847_v17, %s1631_s9  ;;  %854 = vrot.lane.b32.xlu0 %v846_v58, %s1622_s29 }
 0x194   :  { %856 = vrot.lane.b32.xlu1 %v847_v17, %s1622_s29 }
 0x1fe   :  { %v851_v63 = vpop.permute.xlu0 %850 }
 0x202   :  { %v853_v51 = vpop.permute.xlu1 %852  ;;  %v855_v22 = vpop.permute.xlu0 %854 }
 0x203   :  { %v860_v34 = vsel %vm849_vm11, %v851_v63, %v855_v22 }
 0x204   :  { %v862_v52 = vmax.f32 %v846_v58, %v860_v34 }
 0x206   :  { %v897_v55 = vadd.f32 1e-05, %v862_v52  ;;  %v857_v57 = vpop.permute.xlu1 %856 }
 0x207   :  { %v861_v1 = vsel %vm849_vm11, %v853_v51, %v857_v57 }
 0x208   :  { %1551 = vrcp.f32 %v897_v55  ;;  %v863_v10 = vmax.f32 %v847_v17, %v861_v1 }
 0x209   :  { %1553 = vrcp.f32 %v999_v0 }
 0x20a   :  { %v898_v12 = vadd.f32 1e-05, %v863_v10 }
 0x20c   :  { %1555 = vrcp.f32 %v898_v12 }
 0x20d   :  { %1557 = vrcp.f32 %v1000_v2 }
 0x212   :  { %v1552_v23 = vpop.eup %1551 }
 0x213   :  { %v900_v33 = vmul.f32 %v1552_v23, %v999_v0  ;;  %v1554_v27 = vpop.eup %1553 }
 0x214   :  { %v904_v36 = vmul.f32 %v1554_v27, %v897_v55 }
 0x215   :  { %v907_v6 = vmul.f32 %v900_v33, %v1693_v13 }
 0x216   :  { %v1556_v21 = vpop.eup %1555 }
 0x217   :  { %v902_v46 = vmul.f32 %v1556_v21, %v1000_v2  ;;  %v1527_v49 = vround.rtne.f32 %v907_v6  ;;  %v1558_v53 = vpop.eup %1557 }
 0x218   :  { %v906_v25 = vmul.f32 %v1558_v53, %v898_v12 }
 0x219   :  { %v908_v18 = vmul.f32 %v902_v46, %v1695_v14  ;;  %v911_v50 = vmul.f32 %v1527_v49, %v904_v36 }
 0x21b   :  { %v1528_v9 = vround.rtne.f32 %v908_v18  ;;  %913 = vst [vmem:[#allocation7] sm:$0xff] %v911_v50 }
 0x21d   :  { %v912_v11 = vmul.f32 %v1528_v9, %v906_v25 }
 0x21f   :  { %914 = vst [vmem:[#allocation7 + $0x8] sm:$0xff] %v912_v11 }
 0x220   :  { %1602 = shalt.err (!%p1599_p1)
}
 0x221   :  { %s1603_s17 = scalar_lea.hbm %s2181_s2, 256 }
 0x222   :  { %p1604_p2 = scmp.ne.s32.totalorder %s2181_s2, %s1603_s17  ;;  %p1607_p3 = scmp.lt.u32.totalorder %s1603_s17, %s2181_s2 }
 0x224   :  { %p1609_p4 = pnand %p1607_p3, %p1604_p2 }
 0x226   :  { %1612 = shalt.err (!%p1609_p4)
}
 0x227   :  { %926 = dma.vmem_to_hbm [thread:$0]  %s921_s13, 256, %s2181_s2, [#allocation6], %s1621_s28, %s1621_s28, %s1622_s29  }
 0x228   :  { %1617 = dma.done.wait [#allocation6], 256  }
 0x229   :  { %1618 = vsyncadd [#allocation6], 4294967040 }
 0x22a   :  { %930 = vsyncpa [#allocation5], 1 }
 0x22b   :  { %931 = vsyncpa [#allocation6], 1 }

</bundles_post_ra>
